<compile_context>
chip_gen: v5e
topology: v5e:2x2
jax: 0.10.0
libtpu: 0.0.40
codegen_flags: <defaults>
</compile_context>

<pallas_src>
import functools

import jax
import jax.numpy as jnp
from jax.experimental import pallas as pl
from jax.experimental.pallas import tpu as pltpu

_EPS = 1e-5  # calc_mean_std default eps (module-level eps=1e-6 unused in forward)


def _style_loss_kernel(x_ref, y_ref, o_ref,
                       sx_ref, sx2_ref, sy_ref, sy2_ref, *,
                       tm, thw, nc, hw):
    i = pl.program_id(0)          # NC block index
    j = pl.program_id(1)          # HW block index (reduction axis, innermost)

    @pl.when(j == 0)
    def _init():
        sx_ref[...] = jnp.zeros_like(sx_ref)
        sx2_ref[...] = jnp.zeros_like(sx2_ref)
        sy_ref[...] = jnp.zeros_like(sy_ref)
        sy2_ref[...] = jnp.zeros_like(sy2_ref)

    # Cast per-tile in VMEM (inputs may be bf16); accumulate stats in f32.
    x = x_ref[...].astype(jnp.float32)
    y = y_ref[...].astype(jnp.float32)

    # Lane (HW) tail mask: edge blocks contain undefined data past HW.
    col = jax.lax.broadcasted_iota(jnp.int32, (tm, thw), 1) + j * thw
    col_ok = col < hw
    x = jnp.where(col_ok, x, 0.0)
    y = jnp.where(col_ok, y, 0.0)

    # Single-pass per-row sum / sum-of-squares over the spatial (lane) axis.
    sx_ref[...] += jnp.sum(x, axis=1, keepdims=True)
    sx2_ref[...] += jnp.sum(x * x, axis=1, keepdims=True)
    sy_ref[...] += jnp.sum(y, axis=1, keepdims=True)
    sy2_ref[...] += jnp.sum(y * y, axis=1, keepdims=True)

    @pl.when(j == pl.num_programs(1) - 1)
    def _finalize():
        inv_hw = 1.0 / hw
        inv_hwm1 = 1.0 / (hw - 1)
        mean_x = sx_ref[...] * inv_hw
        mean_y = sy_ref[...] * inv_hw
        # torch .var default: unbiased (divide by HW-1), then + eps, then sqrt.
        # maximum(..., 0) guards against fp cancellation making var negative.
        var_x = jnp.maximum(sx2_ref[...] - sx_ref[...] * mean_x, 0.0) * inv_hwm1 + _EPS
        var_y = jnp.maximum(sy2_ref[...] - sy_ref[...] * mean_y, 0.0) * inv_hwm1 + _EPS
        std_x = jnp.sqrt(var_x)
        std_y = jnp.sqrt(var_y)

        d = (mean_x - mean_y) ** 2 + (std_x - std_y) ** 2          # (tm, 1)
        # Row (NC) tail mask: drop contributions from rows past NC (the
        # undefined data in those rows never reaches the result — jnp.where
        # selects 0 even if the other branch is inf/NaN).
        row = jax.lax.broadcasted_iota(jnp.int32, (tm, 1), 0) + i * tm
        d = jnp.where(row < nc, d, 0.0)

        partial = jnp.sum(d)                                       # scalar
        # Lane-dense unmasked store; wrapper reads element [i, 0, 0].
        o_ref[...] = jnp.broadcast_to(partial, o_ref.shape).astype(jnp.float32)


def style_loss(x, y, *,
               target_block_bytes=4 * 1024 * 1024,
               max_lanes=8192,
               vmem_limit_bytes=48 * 1024 * 1024):
    """x, y: (N, C, H, W) arrays (any float dtype). Returns scalar f32 loss."""
    assert x.shape == y.shape and x.ndim == 4
    N, C, H, W = x.shape
    NC, HW = N * C, H * W
    assert HW > 1, "unbiased variance (divide by HW-1) requires H*W > 1"

    itemsize = jnp.dtype(x.dtype).itemsize
    # Sublane packing: 8 rows/vreg for f32, 16 for bf16, 32 for int8/fp8.
    pack = max(8, 32 // itemsize)

    # HW (lane) tiling: use the full dim when small enough (legal block
    # last-dim even if not a multiple of 128), else 128-aligned chunks with an
    # in-kernel tail mask.
    if HW <= max_lanes:
        thw = HW
    else:
        thw = max_lanes - (max_lanes % 128)
    n_hw_blocks = pl.cdiv(HW, thw)

    # Row tile ~ target_block_bytes per input buffer, rounded to sublane
    # packing and clamped to the (packed) data size.
    rows = max(pack, target_block_bytes // max(1, thw * itemsize))
    tm = max(pack, (rows // pack) * pack)
    tm = min(tm, pl.cdiv(NC, pack) * pack)
    n_nc_blocks = pl.cdiv(NC, tm)

    x2d = x.reshape(NC, HW)
    y2d = y.reshape(NC, HW)

    kernel = functools.partial(_style_loss_kernel, tm=tm, thw=thw, nc=NC, hw=HW)

    out = pl.pallas_call(
        kernel,
        out_shape=jax.ShapeDtypeStruct((n_nc_blocks, 8, 128), jnp.float32),
        grid_spec=pltpu.PrefetchScalarGridSpec(
            num_scalar_prefetch=0,
            grid=(n_nc_blocks, n_hw_blocks),
            in_specs=[
                pl.BlockSpec((tm, thw), lambda i, j: (i, j)),
                pl.BlockSpec((tm, thw), lambda i, j: (i, j)),
            ],
            # Per-NC-block partial sums in a lane-dense (8,128) tile each.
            out_specs=pl.BlockSpec((1, 8, 128), lambda i, j: (i, 0, 0)),
            scratch_shapes=[pltpu.VMEM((tm, 1), jnp.float32)] * 4,  # Σx, Σx², Σy, Σy²
        ),
        compiler_params=pltpu.CompilerParams(
            # NC axis parallel (both TensorCores on v7x), HW axis is the reduction.
            dimension_semantics=("parallel", "arbitrary"),
            vmem_limit_bytes=vmem_limit_bytes,
        ),
        cost_estimate=pl.CostEstimate(
            flops=6 * NC * HW,
            transcendentals=2 * NC,
            bytes_accessed=2 * NC * HW * itemsize,
        ),
    )(x2d, y2d)

    # Tiny cross-block reduction + the two MSE 1/(N*C) normalizations.
    return jnp.sum(out[:, 0, 0]) * (1.0 / NC)


def _style_loss_ref(x, y, eps=_EPS):
    """Pure-JAX reference mirroring the PyTorch module."""
    N, C, H, W = x.shape
    xf = x.reshape(N, C, -1).astype(jnp.float32)
    yf = y.reshape(N, C, -1).astype(jnp.float32)
    mean_x = xf.mean(axis=2)
    mean_y = yf.mean(axis=2)
    std_x = jnp.sqrt(xf.var(axis=2, ddof=1) + eps)
    std_y = jnp.sqrt(yf.var(axis=2, ddof=1) + eps)
    return jnp.mean((mean_x - mean_y) ** 2) + jnp.mean((std_x - std_y) ** 2)


if __name__ == "__main__":
    key = jax.random.PRNGKey(0)

    # Case 1: aligned small shape (single block).
    kx, ky = jax.random.split(key)
    x = jax.random.normal(kx, (2, 4, 16, 16), dtype=jnp.float32)
    y = 0.5 * jax.random.normal(ky, (2, 4, 16, 16), dtype=jnp.float32) + 0.3
    loss = style_loss(x, y)
    jax.block_until_ready(loss)
    ref = _style_loss_ref(x, y)
    assert jnp.allclose(loss, ref, rtol=1e-4, atol=1e-6), (loss, ref)

    # Case 2: unaligned NC/HW (row tail masking, HW not a multiple of 128).
    kx2, ky2 = jax.random.split(kx)
    x2 = jax.random.normal(kx2, (2, 3, 7, 9), dtype=jnp.float32)
    y2 = 0.7 * jax.random.normal(ky2, (2, 3, 7, 9), dtype=jnp.float32) - 0.2
    loss2 = style_loss(x2, y2)
    jax.block_until_ready(loss2)
    ref2 = _style_loss_ref(x2, y2)
    assert jnp.allclose(loss2, ref2, rtol=1e-4, atol=1e-6), (loss2, ref2)

    # Case 3: force HW chunking (multi-step reduction axis + lane tail mask).
    kx3, ky3 = jax.random.split(ky)
    x3 = jax.random.normal(kx3, (2, 3, 10, 20), dtype=jnp.float32)   # HW=200
    y3 = 1.3 * jax.random.normal(ky3, (2, 3, 10, 20), dtype=jnp.float32)
    loss3 = style_loss(x3, y3, max_lanes=128)
    jax.block_until_ready(loss3)
    ref3 = _style_loss_ref(x3, y3)
    assert jnp.allclose(loss3, ref3, rtol=1e-4, atol=1e-6), (loss3, ref3)

    print("KERNEL_OK")
</pallas_src>

<mosaic_0001>
module attributes {stable_mosaic.version = 11 : i64} {
  func.func @_style_loss_kernel(%arg0: i32, %arg1: i32, %arg2: memref<8x256xf32, #tpu.memory_space<vmem>>, %arg3: memref<8x256xf32, #tpu.memory_space<vmem>>, %arg4: memref<1x8x128xf32, #tpu.memory_space<vmem>>, %arg5: memref<8x1xf32, #tpu.memory_space<vmem>>, %arg6: memref<8x1xf32, #tpu.memory_space<vmem>>, %arg7: memref<8x1xf32, #tpu.memory_space<vmem>>, %arg8: memref<8x1xf32, #tpu.memory_space<vmem>>) attributes {dimension_semantics = [#tpu.dimension_semantics<parallel>, #tpu.dimension_semantics<arbitrary>], iteration_bounds = array<i64: 1, 1>, scalar_prefetch = 0 : i64, scratch_operands = 4 : i64, tpu.core_type = #tpu.core_type<tc>, window_params = [{transform_indices = @transform_0, window_bounds = array<i64: 8, 256>}, {transform_indices = @transform_1, window_bounds = array<i64: 8, 256>}, {transform_indices = @transform_2, window_bounds = array<i64: 1, 8, 128>}]} {
    %c0_i32 = arith.constant 0 : i32
    %0 = arith.cmpi eq, %arg1, %c0_i32 : i32
    %1 = arith.extui %0 : i1 to i32
    %c0_i32_0 = arith.constant 0 : i32
    %2 = arith.cmpi ne, %1, %c0_i32_0 : i32
    scf.if %2 {
      %cst_28 = arith.constant 0.000000e+00 : f32
      %40 = vector.broadcast %cst_28 : f32 to vector<8x1xf32>
      %c0_29 = arith.constant 0 : index
      %c0_30 = arith.constant 0 : index
      %41 = vector.load %arg5[%c0_29, %c0_30] : memref<8x1xf32, #tpu.memory_space<vmem>>, vector<8x1xf32>
      tpu.vector_store %arg5[%c0_29, %c0_30], %40 {strides = array<i32>} : memref<8x1xf32, #tpu.memory_space<vmem>>, vector<8x1xf32>,
      %cst_31 = arith.constant 0.000000e+00 : f32
      %42 = vector.broadcast %cst_31 : f32 to vector<8x1xf32>
      %c0_32 = arith.constant 0 : index
      %c0_33 = arith.constant 0 : index
      %43 = vector.load %arg6[%c0_32, %c0_33] : memref<8x1xf32, #tpu.memory_space<vmem>>, vector<8x1xf32>
      tpu.vector_store %arg6[%c0_32, %c0_33], %42 {strides = array<i32>} : memref<8x1xf32, #tpu.memory_space<vmem>>, vector<8x1xf32>,
      %cst_34 = arith.constant 0.000000e+00 : f32
      %44 = vector.broadcast %cst_34 : f32 to vector<8x1xf32>
      %c0_35 = arith.constant 0 : index
      %c0_36 = arith.constant 0 : index
      %45 = vector.load %arg7[%c0_35, %c0_36] : memref<8x1xf32, #tpu.memory_space<vmem>>, vector<8x1xf32>
      tpu.vector_store %arg7[%c0_35, %c0_36], %44 {strides = array<i32>} : memref<8x1xf32, #tpu.memory_space<vmem>>, vector<8x1xf32>,
      %cst_37 = arith.constant 0.000000e+00 : f32
      %46 = vector.broadcast %cst_37 : f32 to vector<8x1xf32>
      %c0_38 = arith.constant 0 : index
      %c0_39 = arith.constant 0 : index
      %47 = vector.load %arg8[%c0_38, %c0_39] : memref<8x1xf32, #tpu.memory_space<vmem>>, vector<8x1xf32>
      tpu.vector_store %arg8[%c0_38, %c0_39], %46 {strides = array<i32>} : memref<8x1xf32, #tpu.memory_space<vmem>>, vector<8x1xf32>,
    } else {
    }
    %c0 = arith.constant 0 : index
    %c0_1 = arith.constant 0 : index
    %3 = vector.load %arg2[%c0, %c0_1] : memref<8x256xf32, #tpu.memory_space<vmem>>, vector<8x256xf32>
    %c0_2 = arith.constant 0 : index
    %c0_3 = arith.constant 0 : index
    %4 = vector.load %arg3[%c0_2, %c0_3] : memref<8x256xf32, #tpu.memory_space<vmem>>, vector<8x256xf32>
    %5 = tpu.iota {dimensions = array<i32: 1>} : vector<8x256xi32>
    %c256_i32 = arith.constant 256 : i32
    %6 = arith.muli %arg1, %c256_i32 : i32
    %7 = vector.broadcast %6 : i32 to vector<8x256xi32>
    %8 = arith.addi %5, %7 : vector<8x256xi32>
    %c256_i32_4 = arith.constant 256 : i32
    %9 = vector.broadcast %c256_i32_4 : i32 to vector<8x256xi32>
    %10 = arith.cmpi slt, %8, %9 : vector<8x256xi32>
    %cst = arith.constant 0.000000e+00 : f32
    %11 = vector.broadcast %cst : f32 to vector<8x256xf32>
    %12 = arith.select %10, %3, %11 : vector<8x256xi1>, vector<8x256xf32>
    %cst_5 = arith.constant 0.000000e+00 : f32
    %13 = vector.broadcast %cst_5 : f32 to vector<8x256xf32>
    %14 = arith.select %10, %4, %13 : vector<8x256xi1>, vector<8x256xf32>
    %c0_6 = arith.constant 0 : index
    %c0_7 = arith.constant 0 : index
    %15 = vector.load %arg5[%c0_6, %c0_7] : memref<8x1xf32, #tpu.memory_space<vmem>>, vector<8x1xf32>
    %cst_8 = arith.constant dense<0.000000e+00> : vector<8xf32>
    %16 = vector.multi_reduction <add>, %12, %cst_8 [1] : vector<8x256xf32> to vector<8xf32>
    %17 = vector.shape_cast %16 : vector<8xf32> to vector<8x1xf32>
    %18 = arith.addf %15, %17 : vector<8x1xf32>
    %c0_9 = arith.constant 0 : index
    %c0_10 = arith.constant 0 : index
    %19 = vector.load %arg5[%c0_9, %c0_10] : memref<8x1xf32, #tpu.memory_space<vmem>>, vector<8x1xf32>
    tpu.vector_store %arg5[%c0_9, %c0_10], %18 {strides = array<i32>} : memref<8x1xf32, #tpu.memory_space<vmem>>, vector<8x1xf32>,
    %c0_11 = arith.constant 0 : index
    %c0_12 = arith.constant 0 : index
    %20 = vector.load %arg6[%c0_11, %c0_12] : memref<8x1xf32, #tpu.memory_space<vmem>>, vector<8x1xf32>
    %21 = arith.mulf %12, %12 : vector<8x256xf32>
    %cst_13 = arith.constant dense<0.000000e+00> : vector<8xf32>
    %22 = vector.multi_reduction <add>, %21, %cst_13 [1] : vector<8x256xf32> to vector<8xf32>
    %23 = vector.shape_cast %22 : vector<8xf32> to vector<8x1xf32>
    %24 = arith.addf %20, %23 : vector<8x1xf32>
    %c0_14 = arith.constant 0 : index
    %c0_15 = arith.constant 0 : index
    %25 = vector.load %arg6[%c0_14, %c0_15] : memref<8x1xf32, #tpu.memory_space<vmem>>, vector<8x1xf32>
    tpu.vector_store %arg6[%c0_14, %c0_15], %24 {strides = array<i32>} : memref<8x1xf32, #tpu.memory_space<vmem>>, vector<8x1xf32>,
    %c0_16 = arith.constant 0 : index
    %c0_17 = arith.constant 0 : index
    %26 = vector.load %arg7[%c0_16, %c0_17] : memref<8x1xf32, #tpu.memory_space<vmem>>, vector<8x1xf32>
    %cst_18 = arith.constant dense<0.000000e+00> : vector<8xf32>
    %27 = vector.multi_reduction <add>, %14, %cst_18 [1] : vector<8x256xf32> to vector<8xf32>
    %28 = vector.shape_cast %27 : vector<8xf32> to vector<8x1xf32>
    %29 = arith.addf %26, %28 : vector<8x1xf32>
    %c0_19 = arith.constant 0 : index
    %c0_20 = arith.constant 0 : index
    %30 = vector.load %arg7[%c0_19, %c0_20] : memref<8x1xf32, #tpu.memory_space<vmem>>, vector<8x1xf32>
    tpu.vector_store %arg7[%c0_19, %c0_20], %29 {strides = array<i32>} : memref<8x1xf32, #tpu.memory_space<vmem>>, vector<8x1xf32>,
    %c0_21 = arith.constant 0 : index
    %c0_22 = arith.constant 0 : index
    %31 = vector.load %arg8[%c0_21, %c0_22] : memref<8x1xf32, #tpu.memory_space<vmem>>, vector<8x1xf32>
    %32 = arith.mulf %14, %14 : vector<8x256xf32>
    %cst_23 = arith.constant dense<0.000000e+00> : vector<8xf32>
    %33 = vector.multi_reduction <add>, %32, %cst_23 [1] : vector<8x256xf32> to vector<8xf32>
    %34 = vector.shape_cast %33 : vector<8xf32> to vector<8x1xf32>
    %35 = arith.addf %31, %34 : vector<8x1xf32>
    %c0_24 = arith.constant 0 : index
    %c0_25 = arith.constant 0 : index
    %36 = vector.load %arg8[%c0_24, %c0_25] : memref<8x1xf32, #tpu.memory_space<vmem>>, vector<8x1xf32>
    tpu.vector_store %arg8[%c0_24, %c0_25], %35 {strides = array<i32>} : memref<8x1xf32, #tpu.memory_space<vmem>>, vector<8x1xf32>,
    %c0_i32_26 = arith.constant 0 : i32
    %37 = arith.cmpi eq, %arg1, %c0_i32_26 : i32
    %38 = arith.extui %37 : i1 to i32
    %c0_i32_27 = arith.constant 0 : i32
    %39 = arith.cmpi ne, %38, %c0_i32_27 : i32
    scf.if %39 {
      %c0_28 = arith.constant 0 : index
      %c0_29 = arith.constant 0 : index
      %40 = vector.load %arg5[%c0_28, %c0_29] : memref<8x1xf32, #tpu.memory_space<vmem>>, vector<8x1xf32>
      %cst_30 = arith.constant 3.906250e-03 : f32
      %41 = vector.broadcast %cst_30 : f32 to vector<8x1xf32>
      %42 = arith.mulf %40, %41 : vector<8x1xf32>
      %c0_31 = arith.constant 0 : index
      %c0_32 = arith.constant 0 : index
      %43 = vector.load %arg7[%c0_31, %c0_32] : memref<8x1xf32, #tpu.memory_space<vmem>>, vector<8x1xf32>
      %cst_33 = arith.constant 3.906250e-03 : f32
      %44 = vector.broadcast %cst_33 : f32 to vector<8x1xf32>
      %45 = arith.mulf %43, %44 : vector<8x1xf32>
      %c0_34 = arith.constant 0 : index
      %c0_35 = arith.constant 0 : index
      %46 = vector.load %arg6[%c0_34, %c0_35] : memref<8x1xf32, #tpu.memory_space<vmem>>, vector<8x1xf32>
      %c0_36 = arith.constant 0 : index
      %c0_37 = arith.constant 0 : index
      %47 = vector.load %arg5[%c0_36, %c0_37] : memref<8x1xf32, #tpu.memory_space<vmem>>, vector<8x1xf32>
      %48 = arith.mulf %47, %42 : vector<8x1xf32>
      %49 = arith.subf %46, %48 : vector<8x1xf32>
      %cst_38 = arith.constant 0.000000e+00 : f32
      %50 = vector.broadcast %cst_38 : f32 to vector<8x1xf32>
      %51 = arith.maximumf %49, %50 : vector<8x1xf32>
      %cst_39 = arith.constant 0.00392156886 : f32
      %52 = vector.broadcast %cst_39 : f32 to vector<8x1xf32>
      %53 = arith.mulf %51, %52 : vector<8x1xf32>
      %cst_40 = arith.constant 9.99999974E-6 : f32
      %54 = vector.broadcast %cst_40 : f32 to vector<8x1xf32>
      %55 = arith.addf %53, %54 : vector<8x1xf32>
      %c0_41 = arith.constant 0 : index
      %c0_42 = arith.constant 0 : index
      %56 = vector.load %arg8[%c0_41, %c0_42] : memref<8x1xf32, #tpu.memory_space<vmem>>, vector<8x1xf32>
      %c0_43 = arith.constant 0 : index
      %c0_44 = arith.constant 0 : index
      %57 = vector.load %arg7[%c0_43, %c0_44] : memref<8x1xf32, #tpu.memory_space<vmem>>, vector<8x1xf32>
      %58 = arith.mulf %57, %45 : vector<8x1xf32>
      %59 = arith.subf %56, %58 : vector<8x1xf32>
      %cst_45 = arith.constant 0.000000e+00 : f32
      %60 = vector.broadcast %cst_45 : f32 to vector<8x1xf32>
      %61 = arith.maximumf %59, %60 : vector<8x1xf32>
      %cst_46 = arith.constant 0.00392156886 : f32
      %62 = vector.broadcast %cst_46 : f32 to vector<8x1xf32>
      %63 = arith.mulf %61, %62 : vector<8x1xf32>
      %cst_47 = arith.constant 9.99999974E-6 : f32
      %64 = vector.broadcast %cst_47 : f32 to vector<8x1xf32>
      %65 = arith.addf %63, %64 : vector<8x1xf32>
      %66 = math.sqrt %55 : vector<8x1xf32>
      %67 = math.sqrt %65 : vector<8x1xf32>
      %68 = arith.subf %42, %45 : vector<8x1xf32>
      %69 = arith.mulf %68, %68 : vector<8x1xf32>
      %70 = arith.subf %66, %67 : vector<8x1xf32>
      %71 = arith.mulf %70, %70 : vector<8x1xf32>
      %72 = arith.addf %69, %71 : vector<8x1xf32>
      %73 = tpu.iota {dimensions = array<i32: 0>} : vector<8x1xi32>
      %c8_i32 = arith.constant 8 : i32
      %74 = arith.muli %arg0, %c8_i32 : i32
      %75 = vector.broadcast %74 : i32 to vector<8x1xi32>
      %76 = arith.addi %73, %75 : vector<8x1xi32>
      %c8_i32_48 = arith.constant 8 : i32
      %77 = vector.broadcast %c8_i32_48 : i32 to vector<8x1xi32>
      %78 = arith.cmpi slt, %76, %77 : vector<8x1xi32>
      %cst_49 = arith.constant 0.000000e+00 : f32
      %79 = vector.broadcast %cst_49 : f32 to vector<8x1xf32>
      %80 = arith.select %78, %72, %79 : vector<8x1xi1>, vector<8x1xf32>
      %81 = vector.shape_cast %80 : vector<8x1xf32> to vector<1x8x1xf32>
      %cst_50 = arith.constant dense<0.000000e+00> : vector<1xf32>
      %82 = vector.multi_reduction <add>, %81, %cst_50 [1, 2] : vector<1x8x1xf32> to vector<1xf32>
      %83 = vector.shape_cast %82 : vector<1xf32> to vector<1x1x1xf32>
      %84 = vector.extract %83[0, 0, 0] : f32 from vector<1x1x1xf32>
      %85 = vector.broadcast %84 : f32 to vector<1x8x128xf32>
      %c0_51 = arith.constant 0 : index
      %c0_52 = arith.constant 0 : index
      %c0_53 = arith.constant 0 : index
      %86 = vector.load %arg4[%c0_51, %c0_52, %c0_53] : memref<1x8x128xf32, #tpu.memory_space<vmem>>, vector<1x8x128xf32>
      tpu.vector_store %arg4[%c0_51, %c0_52, %c0_53], %85 {strides = array<i32>} : memref<1x8x128xf32, #tpu.memory_space<vmem>>, vector<1x8x128xf32>,
    } else {
    }
    return
  }
  func.func @transform_0(%arg0: i32, %arg1: i32) -> (i32, i32) {
    %c0_i32 = arith.constant 0 : i32
    return %arg0, %arg1 : i32, i32
  }
  func.func @transform_1(%arg0: i32, %arg1: i32) -> (i32, i32) {
    %c0_i32 = arith.constant 0 : i32
    return %arg0, %arg1 : i32, i32
  }
  func.func @transform_2(%arg0: i32, %arg1: i32) -> (i32, i32, i32) {
    %c0_i32 = arith.constant 0 : i32
    %c0_i32_0 = arith.constant 0 : i32
    %c0_i32_1 = arith.constant 0 : i32
    return %arg0, %c0_i32, %c0_i32_0 : i32, i32, i32
  }
}

</mosaic_0001>

<bundles_post_ra>
// kernel: tpu_custom_call.1
= control target key start
LH: loop header
LB: loop body
LE: loop exit
PB: predicated region body
PF: predicated region fallthrough
CT: control target
= control target key end

     0   :  { %7 = vsyncpa [#allocation7], 0  ;;  %s305_s0 = inlined_call_operand.hbm [shape: f32[8,256], index: 0, kind: input, shape index: {}]   ;;  %s306_s1 = inlined_call_operand.hbm [shape: f32[8,256], index: 1, kind: input, shape index: {}]   ;;  %s307_s2 = inlined_call_operand.hbm [shape: f32[1,8,128], index: 2, kind: output, shape index: {}]  }
   0x1   :  { %8 = vsyncpa [#allocation10], 0 }
   0x2   :  { %9 = vsyncpa [#allocation8], 0  ;;  %s15_s11 = sshll.u32 %s305_s0, 4  ;;  %s268_s12 = smov [#allocation6]   ;;  %s16_s11 = int_to_ptr.hbm [resolvable:$true] %s15_s11 }
   0x3   :  { %s17_s13 = sshll.u32 %s268_s12, 4  ;;  %s26_s16 = sshll.u32 %s306_s1, 4  ;;  %s18_s13 = int_to_ptr.vmem [resolvable:$true] %s17_s13  ;;  %s27_s16 = int_to_ptr.hbm [resolvable:$true] %s26_s16 }
   0x4   :  { %20 = dma.hbm_to_vmem [thread:$0]  %s16_s11, 256, %s18_s13, [#allocation7]  }
   0x5   :  { %s269_s17 = smov [#allocation9]  }
   0x6   :  { %s28_s18 = sshll.u32 %s269_s17, 4  ;;  %s29_s18 = int_to_ptr.vmem [resolvable:$true] %s28_s18 }
   0x7   :  { %31 = dma.hbm_to_vmem [thread:$0]  %s27_s16, 256, %s29_s18, [#allocation10]  }
   0x8   :  { %262 = dma.done.wait [#allocation7], 256  }
   0x9   :  { %263 = vsyncadd [#allocation7], 4294967040 }
   0xa   :  { %264 = dma.done.wait [#allocation10], 256  }
   0xb   :  { %265 = vsyncadd [#allocation10], 4294967040  ;;  %vm44_vm0 = vcmask 7168   ;;  %v270_v0 = vmov 0.0   ;;  %v49_v1 = vld [vmem:[#allocation6] sm:$0xff]  ;;  %v50_v2 = vld [vmem:[#allocation6 + $0x8] sm:$0xff] }
   0xc   :  { %45 = vst.msk [vmem:[#allocation2] sm:$0xff] %vm44_vm0, %v270_v0  ;;  %v67_v3 = vadd.f32 %v50_v2, %v49_v1  ;;  %v74_v4 = vmul.f32 %v49_v1, %v49_v1  ;;  %v75_v5 = vmul.f32 %v50_v2, %v50_v2  ;;  %v51_v7 = vld [vmem:[#allocation9] sm:$0xff]  ;;  %v52_v8 = vld [vmem:[#allocation9 + $0x8] sm:$0xff]  ;;  %s271_s0 = smov [#allocation11]   ;;  %s169_s21 = sshll.u32 %s307_s2, 4  ;;  %s170_s21 = int_to_ptr.hbm [resolvable:$true] %s169_s21 }
   0xd   :  { %46 = vst.msk [vmem:[#allocation3] sm:$0xff] %vm44_vm0, %v270_v0  ;;  %v88_v9 = vmul.f32 %v51_v7, %v51_v7  ;;  %v89_v10 = vmul.f32 %v52_v8, %v52_v8  ;;  %v82_v11 = vadd.f32 %v52_v8, %v51_v7  ;;  %s167_s1 = sshll.u32 %s271_s0, 4  ;;  %s168_s1 = int_to_ptr.vmem [resolvable:$true] %s167_s1 }
   0xe   :  { %47 = vst.msk [vmem:[#allocation4] sm:$0xff] %vm44_vm0, %v270_v0  ;;  %68 = vadd.xlane.f32.xlu0 %v67_v3  ;;  %v76_v6 = vadd.f32 %v75_v5, %v74_v4 }
   0xf   :  { %48 = vst.msk [vmem:[#allocation5] sm:$0xff] %vm44_vm0, %v270_v0  ;;  %v90_v12 = vadd.f32 %v89_v10, %v88_v9 }
  0x10   :  { %77 = vadd.xlane.f32.xlu1 %v76_v6 }
  0x13   :  { %v66_v13 = vld [vmem:[#allocation2] sm:$0xff] }
  0x14   :  { %v73_v15 = vld [vmem:[#allocation3] sm:$0xff] }
  0x15   :  { %v81_v19 = vld [vmem:[#allocation4] sm:$0xff] }
  0x16   :  { %83 = vadd.xlane.f32.xlu0 %v82_v11  ;;  %v87_v21 = vld [vmem:[#allocation5] sm:$0xff] }
  0x18   :  { %91 = vadd.xlane.f32.xlu1 %v90_v12 }
  0x81   :  { %v69_v14 = vpop.xlane.xlu0 %68 }
  0x82   :  { %v70_v16 = vadd.f32 %v69_v14, %v66_v13 }
  0x83   :  { %v78_v17 = vpop.xlane.xlu1 %77 }
  0x84   :  { %72 = vst.msk [vmem:[#allocation2] sm:$0xff] %vm44_vm0, %v70_v16  ;;  %v79_v18 = vadd.f32 %v78_v17, %v73_v15 }
  0x86   :  { %80 = vst.msk [vmem:[#allocation3] sm:$0xff] %vm44_vm0, %v79_v18 }
  0x89   :  { %v84_v20 = vpop.xlane.xlu0 %83 }
  0x8a   :  { %v85_v22 = vadd.f32 %v84_v20, %v81_v19 }
  0x8b   :  { %v92_v23 = vpop.xlane.xlu1 %91  ;;  %v98_v24 = vld [vmem:[#allocation2] sm:$0xff] }
  0x8c   :  { %86 = vst.msk [vmem:[#allocation4] sm:$0xff] %vm44_vm0, %v85_v22  ;;  %v93_v25 = vadd.f32 %v92_v23, %v87_v21  ;;  %v99_v26 = vmul.f32 0.00390625, %v98_v24 }
  0x8d   :  { %v102_v27 = vld [vmem:[#allocation3] sm:$0xff] }
  0x8e   :  { %94 = vst.msk [vmem:[#allocation5] sm:$0xff] %vm44_vm0, %v93_v25  ;;  %v103_v28 = vmul.f32 %v99_v26, %v98_v24 }
  0x90   :  { %v104_v29 = vsub.f32 %v102_v27, %v103_v28 }
  0x92   :  { %v105_v30 = vmax.f32 %v104_v29, 0.0 }
  0x93   :  { %v100_v31 = vld [vmem:[#allocation4] sm:$0xff] }
  0x94   :  { %v101_v32 = vmul.f32 0.00390625, %v100_v31  ;;  %v106_v33 = vmul.f32 0.003921569, %v105_v30 }
  0x95   :  { %v108_v34 = vld [vmem:[#allocation5] sm:$0xff] }
  0x96   :  { %v107_v35 = vadd.f32 1e-05, %v106_v33  ;;  %v109_v36 = vmul.f32 %v101_v32, %v100_v31  ;;  %v138_v59 = vsub.f32 %v99_v26, %v101_v32 }
  0x98   :  { %v110_v37 = vsub.f32 %v108_v34, %v109_v36  ;;  %186 = vrsqrt.f32 %v107_v35  ;;  %vm121_vm1 = vcmp.eq.f32.partialorder %v107_v35, inf  ;;  %v124_v56 = vand.u32 2147483648, %v107_v35 }
  0x99   :  { %vm123_vm3 = vcmp.eq.f32.partialorder %v107_v35, 0.0  ;;  %v139_v63 = vmul.f32 %v138_v59, %v138_v59 }
  0x9a   :  { %v111_v38 = vmax.f32 %v110_v37, 0.0 }
  0x9c   :  { %v112_v39 = vmul.f32 0.003921569, %v111_v38 }
  0x9e   :  { %v187_v40 = vpop.eup %186  ;;  %v113_v41 = vadd.f32 1e-05, %v112_v39 }
  0x9f   :  { %v115_v42 = vmul.f32 %v187_v40, %v107_v35 }
  0xa0   :  { %188 = vrsqrt.f32 %v113_v41  ;;  %vm133_vm2 = vcmp.eq.f32.partialorder %v113_v41, inf  ;;  %v136_v57 = vand.u32 2147483648, %v113_v41  ;;  %vm135_vm4 = vcmp.eq.f32.partialorder %v113_v41, 0.0 }
  0xa1   :  { %v116_v43 = vmul.f32 %v187_v40, %v115_v42 }
  0xa3   :  { %v117_v44 = vmul.f32 0.5, %v116_v43 }
  0xa5   :  { %v118_v45 = vsub.f32 1.5, %v117_v44 }
  0xa6   :  { %v189_v46 = vpop.eup %188 }
  0xa7   :  { %v127_v47 = vmul.f32 %v189_v46, %v113_v41  ;;  %v119_v48 = vmul.f32 %v187_v40, %v118_v45 }
  0xa9   :  { %v128_v49 = vmul.f32 %v189_v46, %v127_v47  ;;  %v120_v51 = vmul.f32 %v119_v48, %v107_v35 }
  0xab   :  { %v129_v50 = vmul.f32 0.5, %v128_v49  ;;  %v122_v54 = vsel %vm121_vm1, %v107_v35, %v120_v51 }
  0xac   :  { %v125_v60 = vsel %vm123_vm3, %v124_v56, %v122_v54 }
  0xad   :  { %v130_v52 = vsub.f32 1.5, %v129_v50 }
  0xaf   :  { %v131_v53 = vmul.f32 %v189_v46, %v130_v52 }
  0xb1   :  { %v132_v55 = vmul.f32 %v131_v53, %v113_v41 }
  0xb3   :  { %v134_v58 = vsel %vm133_vm2, %v113_v41, %v132_v55 }
  0xb4   :  { %v137_v61 = vsel %vm135_vm4, %v136_v57, %v134_v58 }
  0xb5   :  { %v140_v62 = vsub.f32 %v125_v60, %v137_v61 }
  0xb7   :  { %v141_v0 = vmul.f32 %v140_v62, %v140_v62 }
  0xb9   :  { %v142_v1 = vadd.f32 %v141_v0, %v139_v63 }
  0xbb   :  { %v150_v2 = vsel %vm44_vm0, %v142_v1, 0.0 }
  0xbc   :  { %151 = vadd.xlane.f32.xlu2 %v150_v2 }
 0x12f   :  { %v152_v3 = vpop.xlane.xlu2 %151 }
 0x130   :  { %v153_v4 = vrot.slane %v152_v3, 4 }
 0x132   :  { %v154_v5 = vadd.f32 %v153_v4, %v152_v3 }
 0x134   :  { %v155_v6 = vrot.slane %v154_v5, 2 }
 0x136   :  { %v156_v7 = vadd.f32 %v155_v6, %v154_v5 }
 0x138   :  { %v157_v8 = vrot.slane %v156_v7, 1 }
 0x13a   :  { %v158_v9 = vadd.f32 %v157_v8, %v156_v7 }
 0x13c   :  { %180 = vpush %v158_v9 }
 0x16d   :  { %s181_s22 = spop %180 }
 0x16e   :  { %v160_v10 = vstv %s181_s22 }
 0x16f   :  { %161 = vst [vmem:[#allocation11] sm:$0xff] %v160_v10 }
 0x170   :  { %172 = dma.vmem_to_hbm [thread:$0]  %s168_s1, 128, %s170_s21, [#allocation8]  }
 0x171   :  { %266 = dma.done.wait [#allocation8], 128  }
 0x172   :  { %267 = vsyncadd [#allocation8], 4294967168 }
 0x173   :  { %177 = vsyncpa [#allocation7], 1 }
 0x174   :  { %178 = vsyncpa [#allocation10], 1 }
 0x175   :  { %179 = vsyncpa [#allocation8], 1 }

</bundles_post_ra>
